<compile_context>
chip_gen: v7x
topology: tpu7x:2x2x1
jax: 0.10.0
libtpu: 0.0.40
codegen_flags: <defaults>
</compile_context>

<pallas_src>
import functools

import numpy as np
import jax
import jax.numpy as jnp
from jax import lax
from jax.experimental import pallas as pl
from jax.experimental.pallas import tpu as pltpu


def _round_up(x, m):
    return ((x + m - 1) // m) * m


def _rdft2_matrices(win_size, channels):
    """2-D DFT matrices matching torch.fft.rfft2 over a (ws, C) slab.

    Returns (Mr, Mi), each (ws*cr, ws*C) f32, with bins o = k*cr + r and inputs j = m*C + c:
        out[o] = sum_j x[j] * exp(-2i*pi*(k*m/ws + r*c/C)),  k in [0, ws), r in [0, C//2+1).
    """
    ws, C = win_size, channels
    cr = C // 2 + 1
    m_idx = np.repeat(np.arange(ws), C).astype(np.float64)
    c_idx = np.tile(np.arange(C), ws).astype(np.float64)
    k_idx = np.repeat(np.arange(ws), cr).astype(np.float64)
    r_idx = np.tile(np.arange(cr), ws).astype(np.float64)
    theta = 2.0 * np.pi * (np.outer(k_idx, m_idx) / ws + np.outer(r_idx, c_idx) / C)
    return np.cos(theta).astype(np.float32), (-np.sin(theta)).astype(np.float32)


def _stacked_rdft2_matrix(win_size, channels, row_pad):
    """[Mr ; Mi] stacked vertically, each half zero-padded to row_pad rows (sublane aligned),
    so ONE MXU matmul produces the real and imag halves of the fused 2-D DFT."""
    mr, mi = _rdft2_matrices(win_size, channels)
    pad = row_pad - mr.shape[0]
    if pad:
        z = np.zeros((pad, mr.shape[1]), np.float32)
        mr = np.concatenate([mr, z], axis=0)
        mi = np.concatenate([mi, z], axis=0)
    return np.concatenate([mr, mi], axis=0)            # (2*row_pad, ws*C)


def _to_lane_major(x, win_size):
    """(B, C, H, W) -> (ws*C, B*nH*nW*ws) in ONE XLA transpose.

    Column r = ((b*nH+h)*nW+w)*ws + m1 indexes a (ws, C) window row-slab; row j = m2*C + c.
    This is exactly window_partition(x, ws).reshape(-1, ws*C).T, but fused into a single
    copy instead of a window-partition pass plus a separate transpose/pad pass.
    """
    ws = win_size
    B, C, H, W = x.shape
    nH, nW = H // ws, W // ws
    x = x.astype(jnp.float32).reshape(B, C, nH, ws, nW, ws)   # (b, c, h, m1, w, m2)
    x = jnp.transpose(x, (5, 1, 0, 2, 4, 3))                  # (m2, c, b, h, w, m1)
    return x.reshape(ws * C, B * nH * nW * ws)


@functools.partial(jax.jit, static_argnames=("ws", "TR", "CHUNK", "nblocks", "row_pad"))
def _freloss_device(pred, target, w, nsel_blocks, m, denom, loss_weight,
                    *, ws, TR, CHUNK, nblocks, row_pad):
    C = pred.shape[1]
    wsC = ws * C
    two_rp = 2 * row_pad
    n_chunks = TR // CHUNK

    xp = _to_lane_major(pred, ws)       # (wsC, Rraw): row-slabs on lanes
    xt = _to_lane_major(target, ws)

    def kernel(nsel_ref, w_ref, xp_ref, xt_ref, m_ref, out_ref):
        blk = pl.program_id(0)

        @pl.when(nsel_ref[blk] == 0)
        def _():
            # Fully masked-out block: skip matmul + transcendentals, emit zero partials.
            out_ref[0] = jnp.zeros((1, 128), jnp.float32)

        @pl.when(nsel_ref[blk] != 0)
        def _():
            m_mat = m_ref[...]          # (2*row_pad, wsC): [cos ; -sin] fused 2-D rDFT

            def chunk(keep, xp_raw, xt_raw, amp_acc, pha_acc):
                # `keep` zeroes masked-out rows AND the garbage lanes of a ragged last
                # block (no wrapper-side pad pass); zeroed columns contribute exactly 0
                # to both sums, so no post-reduce weight multiply is needed.
                xp_c = jnp.where(keep, xp_raw, 0.0)
                xt_c = jnp.where(keep, xt_raw, 0.0)
                # f32 MXU matmul kept at default precision (documented accuracy choice).
                yp = jnp.dot(m_mat, xp_c, preferred_element_type=jnp.float32)
                yt = jnp.dot(m_mat, xt_c, preferred_element_type=jnp.float32)
                yr_p, yi_p = yp[:row_pad], yp[row_pad:]
                yr_t, yi_t = yt[:row_pad], yt[row_pad:]
                amp_d = jnp.abs(jnp.sqrt(yr_p * yr_p + yi_p * yi_p)
                                - jnp.sqrt(yr_t * yr_t + yi_t * yi_t))
                # Two arctan2 calls kept on purpose: |angle(p) - angle(t)| must match torch
                # (a single wrapped atan2-of-products would change the semantics).
                pha_d = jnp.abs(jnp.arctan2(yi_p, yr_p) - jnp.arctan2(yi_t, yr_t))
                amp_acc = amp_acc + jnp.sum(amp_d, axis=0, keepdims=True)
                pha_acc = pha_acc + jnp.sum(pha_d, axis=0, keepdims=True)
                return amp_acc, pha_acc

            zero = jnp.zeros((1, CHUNK), jnp.float32)
            if n_chunks == 1:
                amp_acc, pha_acc = chunk(w_ref[...] > 0.0, xp_ref[...], xt_ref[...],
                                         zero, zero)
            else:
                def body(ci, carry):
                    off = pl.multiple_of(ci * CHUNK, CHUNK)
                    return chunk(w_ref[:, pl.ds(off, CHUNK)] > 0.0,
                                 xp_ref[:, pl.ds(off, CHUNK)],
                                 xt_ref[:, pl.ds(off, CHUNK)],
                                 *carry)
                amp_acc, pha_acc = lax.fori_loop(0, n_chunks, body, (zero, zero))

            lanes = lax.broadcasted_iota(jnp.int32, (1, 128), 1)
            out_ref[0] = jnp.where(lanes == 0, jnp.sum(amp_acc),
                                   jnp.where(lanes == 1, jnp.sum(pha_acc), 0.0))

    # Explicit scoped-VMEM budget: double-buffered inputs + weight row + DFT matrix
    # + chunk-local intermediates, with headroom; well under 64 MiB (v7x) everywhere.
    vmem_limit = int(min(
        4 * (2 * 2 * wsC * TR + 2 * 8 * TR + 2 * two_rp * wsC)
        + 24 * two_rp * CHUNK * 4 + (16 << 20),
        64 << 20))

    partials = pl.pallas_call(
        kernel,
        out_shape=jax.ShapeDtypeStruct((nblocks, 1, 128), jnp.float32),
        grid_spec=pltpu.PrefetchScalarGridSpec(
            num_scalar_prefetch=1,
            grid=(nblocks,),
            in_specs=[
                pl.BlockSpec((1, TR), lambda i, nsel: (0, i)),        # 0/1 row weight
                pl.BlockSpec((wsC, TR), lambda i, nsel: (0, i)),      # pred slabs (lane-major)
                pl.BlockSpec((wsC, TR), lambda i, nsel: (0, i)),      # target slabs
                pl.BlockSpec((two_rp, wsC), lambda i, nsel: (0, 0)),  # stacked DFT matrix
            ],
            out_specs=pl.BlockSpec((1, 1, 128), lambda i, nsel: (i, 0, 0)),
        ),
        compiler_params=pltpu.CompilerParams(
            dimension_semantics=("parallel",),
            vmem_limit_bytes=vmem_limit),
    )(nsel_blocks, w, xp, xt, m)

    amp_total = jnp.sum(partials[:, 0, 0])
    pha_total = jnp.sum(partials[:, 0, 1])
    return loss_weight * (amp_total + pha_total) / denom


def mask_freloss(pred, target, mask_disruption, *, win_size, loss_weight=1.0):
    """Forward of MaskFreloss (reduction='mean').

    API contract: mask_disruption must be a host-side boolean array of length n_windows
    (it selects windows, so it has to be concrete); changing the mask does NOT trigger
    recompilation as long as the input shapes are unchanged.
    """
    ws = win_size
    B, C, H, W = pred.shape
    nH, nW = H // ws, W // ws
    Nw = B * nH * nW
    mask = np.asarray(mask_disruption).astype(bool).reshape(-1)
    assert mask.shape[0] == Nw
    n_sel = int(mask.sum())
    if n_sel == 0:
        # TODO(synk): torch would take the mean of an empty tensor (NaN); define as 0 here.
        return jnp.float32(0.0)

    cr = C // 2 + 1
    wscr = ws * cr
    row_pad = _round_up(wscr, 8)          # sublane-aligned half-height of the stacked DFT
    Rraw = Nw * ws                        # number of (ws, C) row-slabs
    wsC = ws * C

    # Block width TR (lanes per grid step): large enough to amortize the ~0.35us/step
    # pipeline overhead, bounded by a VMEM budget, and split so nblocks >= 2 whenever the
    # input allows it (keeps both v7x TensorCores busy under dimension_semantics=parallel).
    R128 = _round_up(Rraw, 128)
    lane_budget = max(128, ((16 << 20) // (16 * wsC)) // 128 * 128)
    TR = min(8192, R128, lane_budget)
    if R128 >= 256:
        TR = min(TR, _round_up(R128 // 2, 128))
    TR = max(128, TR)
    nblocks = -(-Rraw // TR)
    CHUNK = 512 if TR % 512 == 0 else (256 if TR % 256 == 0 else 128)

    # Host-side 0/1 per-row weight and per-block occupancy (tiny numpy work, no recompiles).
    w_rows = np.zeros(nblocks * TR, np.float32)
    w_rows[:Rraw] = np.repeat(mask.astype(np.float32), ws)
    nsel_blocks = (w_rows.reshape(nblocks, TR).sum(axis=1) > 0).astype(np.int32)

    m = _stacked_rdft2_matrix(ws, C, row_pad)
    denom = jnp.float32(n_sel * ws * wscr)

    return _freloss_device(pred, target,
                           jnp.asarray(w_rows).reshape(1, -1),
                           jnp.asarray(nsel_blocks),
                           jnp.asarray(m),
                           denom, jnp.float32(loss_weight),
                           ws=ws, TR=TR, CHUNK=CHUNK,
                           nblocks=nblocks, row_pad=row_pad)


# ----------------------------- references (for the self-test) -----------------------------

def _window_partition_ref(x, win_size):
    x = jnp.transpose(x, (0, 2, 3, 1))
    B, H, W, C = x.shape
    x = x.reshape(B, H // win_size, win_size, W // win_size, win_size, C)
    x = jnp.transpose(x, (0, 1, 3, 2, 4, 5))
    return x.reshape(-1, win_size, win_size, C)


def _reference_loss_rfft2(pred, target, mask_disruption, *, win_size, loss_weight=1.0):
    ws = win_size
    idx = np.nonzero(np.asarray(mask_disruption))[0]
    pw = jnp.take(_window_partition_ref(pred, ws), jnp.asarray(idx), axis=0)
    tw = jnp.take(_window_partition_ref(target, ws), jnp.asarray(idx), axis=0)
    fp = jnp.fft.rfft2(pw)
    ft = jnp.fft.rfft2(tw)
    amp = jnp.mean(jnp.abs(jnp.abs(fp) - jnp.abs(ft)))
    pha = jnp.mean(jnp.abs(jnp.angle(fp) - jnp.angle(ft)))
    return loss_weight * amp + loss_weight * pha


def _reference_loss_dft(pred, target, mask_disruption, *, win_size, loss_weight=1.0):
    # Same math as the kernel (explicit fused DFT), pure jnp — tight correctness check.
    ws = win_size
    pw = _window_partition_ref(pred, ws).astype(jnp.float32)
    tw = _window_partition_ref(target, ws).astype(jnp.float32)
    Nw, _, _, C = pw.shape
    mr, mi = _rdft2_matrices(ws, C)                    # (ws*cr, ws*C)
    mrj, mij = jnp.asarray(mr), jnp.asarray(mi)
    idx = np.nonzero(np.asarray(mask_disruption))[0]
    pw = jnp.take(pw, jnp.asarray(idx), axis=0).reshape(-1, ws * C)
    tw = jnp.take(tw, jnp.asarray(idx), axis=0).reshape(-1, ws * C)

    def amp_pha(x):
        yr = x @ mrj.T
        yi = x @ mij.T
        return jnp.sqrt(yr * yr + yi * yi), jnp.arctan2(yi, yr)

    ap, pp = amp_pha(pw)
    at, pt = amp_pha(tw)
    amp = jnp.mean(jnp.abs(ap - at))
    pha = jnp.mean(jnp.abs(pp - pt))
    return loss_weight * (amp + pha)


if __name__ == "__main__":
    key = jax.random.PRNGKey(0)
    k1, k2 = jax.random.split(key)
    B, C, H, W = 2, 4, 16, 16
    win_size = 8
    loss_weight = 1.0

    pred = jax.random.uniform(k1, (B, C, H, W), dtype=jnp.float32)
    target = jax.random.uniform(k2, (B, C, H, W), dtype=jnp.float32)

    n_windows = B * (H // win_size) * (W // win_size)  # = 8
    mask_disruption = np.array(
        [True, False, True, True, False, False, True, False])
    assert mask_disruption.shape[0] == n_windows

    loss = mask_freloss(pred, target, mask_disruption,
                        win_size=win_size, loss_weight=loss_weight)
    loss = jax.block_until_ready(loss)

    ref_dft = jax.block_until_ready(
        _reference_loss_dft(pred, target, mask_disruption,
                            win_size=win_size, loss_weight=loss_weight))
    ref_fft = jax.block_until_ready(
        _reference_loss_rfft2(pred, target, mask_disruption,
                              win_size=win_size, loss_weight=loss_weight))

    assert np.isfinite(float(loss))
    # Tight check against the matched-math (explicit DFT) reference.
    assert abs(float(loss) - float(ref_dft)) < 2e-2, (float(loss), float(ref_dft))
    # Loose sanity check against library rfft2: exactly-real bins (DC/Nyquist) carry a
    # +/-pi branch-cut ambiguity between an explicit DFT and a library FFT.
    assert abs(float(loss) - float(ref_fft)) < 1e-1, (float(loss), float(ref_fft))
    print("KERNEL_OK")
</pallas_src>

<mosaic_0001>
module attributes {stable_mosaic.version = 11 : i64} {
  func.func @kernel(%arg0: i32, %arg1: memref<1xi32, #tpu.memory_space<smem>>, %arg2: memref<1x128xf32, #tpu.memory_space<vmem>>, %arg3: memref<32x128xf32, #tpu.memory_space<vmem>>, %arg4: memref<32x128xf32, #tpu.memory_space<vmem>>, %arg5: memref<48x32xf32, #tpu.memory_space<vmem>>, %arg6: memref<1x1x128xf32, #tpu.memory_space<vmem>>) attributes {dimension_semantics = [#tpu.dimension_semantics<parallel>], iteration_bounds = array<i64: 1>, scalar_prefetch = 1 : i64, scratch_operands = 0 : i64, tpu.core_type = #tpu.core_type<tc>, window_params = [{transform_indices = @transform_0, window_bounds = array<i64: 1, 128>}, {transform_indices = @transform_1, window_bounds = array<i64: 32, 128>}, {transform_indices = @transform_2, window_bounds = array<i64: 32, 128>}, {pipeline_mode = #tpu.pipeline_mode<synchronous>, transform_indices = @transform_3, window_bounds = array<i64: 48, 32>}, {transform_indices = @transform_4, window_bounds = array<i64: 1, 1, 128>}]} {
    %0 = arith.index_cast %arg0 : i32 to index
    %1 = memref.load %arg1[%0] : memref<1xi32, #tpu.memory_space<smem>>
    %c0_i32 = arith.constant 0 : i32
    %2 = arith.cmpi eq, %1, %c0_i32 : i32
    %3 = arith.extui %2 : i1 to i32
    %c0_i32_0 = arith.constant 0 : i32
    %4 = arith.cmpi ne, %3, %c0_i32_0 : i32
    scf.if %4 {
      %cst = arith.constant 0.000000e+00 : f32
      %10 = vector.broadcast %cst : f32 to vector<1x128xf32>
      %c0 = arith.constant 0 : index
      %c0_3 = arith.constant 0 : index
      %c0_4 = arith.constant 0 : index
      %11 = vector.load %arg6[%c0, %c0_3, %c0_4] : memref<1x1x128xf32, #tpu.memory_space<vmem>>, vector<1x1x128xf32>
      %12 = vector.shape_cast %11 : vector<1x1x128xf32> to vector<1x128xf32>
      %13 = vector.shape_cast %10 : vector<1x128xf32> to vector<1x1x128xf32>
      tpu.vector_store %arg6[%c0, %c0_3, %c0_4], %13 {strides = array<i32>} : memref<1x1x128xf32, #tpu.memory_space<vmem>>, vector<1x1x128xf32>,
    } else {
    }
    %5 = arith.index_cast %arg0 : i32 to index
    %6 = memref.load %arg1[%5] : memref<1xi32, #tpu.memory_space<smem>>
    %c0_i32_1 = arith.constant 0 : i32
    %7 = arith.cmpi ne, %6, %c0_i32_1 : i32
    %8 = arith.extui %7 : i1 to i32
    %c0_i32_2 = arith.constant 0 : i32
    %9 = arith.cmpi ne, %8, %c0_i32_2 : i32
    scf.if %9 {
      %c0 = arith.constant 0 : index
      %c0_3 = arith.constant 0 : index
      %10 = vector.load %arg5[%c0, %c0_3] : memref<48x32xf32, #tpu.memory_space<vmem>>, vector<48x32xf32>
      %cst = arith.constant 0.000000e+00 : f32
      %11 = vector.broadcast %cst : f32 to vector<1x128xf32>
      %c0_4 = arith.constant 0 : index
      %c0_5 = arith.constant 0 : index
      %12 = vector.load %arg2[%c0_4, %c0_5] : memref<1x128xf32, #tpu.memory_space<vmem>>, vector<1x128xf32>
      %cst_6 = arith.constant 0.000000e+00 : f32
      %13 = vector.broadcast %cst_6 : f32 to vector<1x128xf32>
      %14 = arith.cmpf ogt, %12, %13 : vector<1x128xf32>
      %c0_7 = arith.constant 0 : index
      %c0_8 = arith.constant 0 : index
      %15 = vector.load %arg3[%c0_7, %c0_8] : memref<32x128xf32, #tpu.memory_space<vmem>>, vector<32x128xf32>
      %c0_9 = arith.constant 0 : index
      %c0_10 = arith.constant 0 : index
      %16 = vector.load %arg4[%c0_9, %c0_10] : memref<32x128xf32, #tpu.memory_space<vmem>>, vector<32x128xf32>
      %cst_11 = arith.constant 0.000000e+00 : f32
      %17 = vector.shape_cast %14 : vector<1x128xi1> to vector<1x128xi1>
      %18 = vector.broadcast %17 : vector<1x128xi1> to vector<32x128xi1>
      %19 = vector.broadcast %cst_11 : f32 to vector<32x128xf32>
      %20 = arith.select %18, %15, %19 : vector<32x128xi1>, vector<32x128xf32>
      %cst_12 = arith.constant 0.000000e+00 : f32
      %21 = vector.shape_cast %14 : vector<1x128xi1> to vector<1x128xi1>
      %22 = vector.broadcast %21 : vector<1x128xi1> to vector<32x128xi1>
      %23 = vector.broadcast %cst_12 : f32 to vector<32x128xf32>
      %24 = arith.select %22, %16, %23 : vector<32x128xi1>, vector<32x128xf32>
      %cst_13 = arith.constant dense<0.000000e+00> : vector<48x128xf32>
      %25 = tpu.matmul %10, %20, %cst_13 {dimension_numbers = #tpu.dot_dimension_numbers<[1], [0], [0], [1], [0, 0, 1, 1], [], []>} : vector<48x32xf32>, vector<32x128xf32>, vector<48x128xf32> -> vector<48x128xf32>
      %cst_14 = arith.constant dense<0.000000e+00> : vector<48x128xf32>
      %26 = tpu.matmul %10, %24, %cst_14 {dimension_numbers = #tpu.dot_dimension_numbers<[1], [0], [0], [1], [0, 0, 1, 1], [], []>} : vector<48x32xf32>, vector<32x128xf32>, vector<48x128xf32> -> vector<48x128xf32>
      %27 = vector.extract_strided_slice %25 {offsets = [0, 0], sizes = [24, 128], strides = [1, 1]} : vector<48x128xf32> to vector<24x128xf32>
      %28 = vector.extract_strided_slice %25 {offsets = [24, 0], sizes = [24, 128], strides = [1, 1]} : vector<48x128xf32> to vector<24x128xf32>
      %29 = vector.extract_strided_slice %26 {offsets = [0, 0], sizes = [24, 128], strides = [1, 1]} : vector<48x128xf32> to vector<24x128xf32>
      %30 = vector.extract_strided_slice %26 {offsets = [24, 0], sizes = [24, 128], strides = [1, 1]} : vector<48x128xf32> to vector<24x128xf32>
      %31 = arith.mulf %27, %27 : vector<24x128xf32>
      %32 = arith.mulf %28, %28 : vector<24x128xf32>
      %33 = arith.addf %31, %32 : vector<24x128xf32>
      %34 = math.sqrt %33 : vector<24x128xf32>
      %35 = arith.mulf %29, %29 : vector<24x128xf32>
      %36 = arith.mulf %30, %30 : vector<24x128xf32>
      %37 = arith.addf %35, %36 : vector<24x128xf32>
      %38 = math.sqrt %37 : vector<24x128xf32>
      %39 = arith.subf %34, %38 : vector<24x128xf32>
      %40 = math.absf %39 : vector<24x128xf32>
      %41 = math.atan2 %28, %27 : vector<24x128xf32>
      %42 = math.atan2 %30, %29 : vector<24x128xf32>
      %43 = arith.subf %41, %42 : vector<24x128xf32>
      %44 = math.absf %43 : vector<24x128xf32>
      %cst_15 = arith.constant dense<0.000000e+00> : vector<128xf32>
      %45 = vector.multi_reduction <add>, %40, %cst_15 [0] : vector<24x128xf32> to vector<128xf32>
      %46 = vector.shape_cast %45 : vector<128xf32> to vector<1x128xf32>
      %47 = arith.addf %11, %46 : vector<1x128xf32>
      %cst_16 = arith.constant dense<0.000000e+00> : vector<128xf32>
      %48 = vector.multi_reduction <add>, %44, %cst_16 [0] : vector<24x128xf32> to vector<128xf32>
      %49 = vector.shape_cast %48 : vector<128xf32> to vector<1x128xf32>
      %50 = arith.addf %11, %49 : vector<1x128xf32>
      %51 = tpu.iota {dimensions = array<i32: 1>} : vector<1x128xi32>
      %c0_i32_17 = arith.constant 0 : i32
      %52 = vector.broadcast %c0_i32_17 : i32 to vector<1x128xi32>
      %53 = arith.cmpi eq, %51, %52 : vector<1x128xi32>
      %54 = vector.shape_cast %47 : vector<1x128xf32> to vector<1x1x128xf32>
      %cst_18 = arith.constant dense<0.000000e+00> : vector<1xf32>
      %55 = vector.multi_reduction <add>, %54, %cst_18 [1, 2] : vector<1x1x128xf32> to vector<1xf32>
      %56 = vector.shape_cast %55 : vector<1xf32> to vector<1x1x1xf32>
      %57 = vector.extract %56[0, 0, 0] : f32 from vector<1x1x1xf32>
      %c1_i32 = arith.constant 1 : i32
      %58 = vector.broadcast %c1_i32 : i32 to vector<1x128xi32>
      %59 = arith.cmpi eq, %51, %58 : vector<1x128xi32>
      %60 = vector.shape_cast %50 : vector<1x128xf32> to vector<1x1x128xf32>
      %cst_19 = arith.constant dense<0.000000e+00> : vector<1xf32>
      %61 = vector.multi_reduction <add>, %60, %cst_19 [1, 2] : vector<1x1x128xf32> to vector<1xf32>
      %62 = vector.shape_cast %61 : vector<1xf32> to vector<1x1x1xf32>
      %63 = vector.extract %62[0, 0, 0] : f32 from vector<1x1x1xf32>
      %cst_20 = arith.constant 0.000000e+00 : f32
      %64 = vector.broadcast %63 : f32 to vector<1x128xf32>
      %65 = vector.broadcast %cst_20 : f32 to vector<1x128xf32>
      %66 = arith.select %59, %64, %65 : vector<1x128xi1>, vector<1x128xf32>
      %67 = vector.broadcast %57 : f32 to vector<1x128xf32>
      %68 = arith.select %53, %67, %66 : vector<1x128xi1>, vector<1x128xf32>
      %c0_21 = arith.constant 0 : index
      %c0_22 = arith.constant 0 : index
      %c0_23 = arith.constant 0 : index
      %69 = vector.load %arg6[%c0_21, %c0_22, %c0_23] : memref<1x1x128xf32, #tpu.memory_space<vmem>>, vector<1x1x128xf32>
      %70 = vector.shape_cast %69 : vector<1x1x128xf32> to vector<1x128xf32>
      %71 = vector.shape_cast %68 : vector<1x128xf32> to vector<1x1x128xf32>
      tpu.vector_store %arg6[%c0_21, %c0_22, %c0_23], %71 {strides = array<i32>} : memref<1x1x128xf32, #tpu.memory_space<vmem>>, vector<1x1x128xf32>,
    } else {
    }
    return
  }
  func.func @transform_0(%arg0: i32, %arg1: memref<1xi32, #tpu.memory_space<smem>>) -> (i32, i32) {
    %c0_i32 = arith.constant 0 : i32
    %c0_i32_0 = arith.constant 0 : i32
    return %c0_i32, %arg0 : i32, i32
  }
  func.func @transform_1(%arg0: i32, %arg1: memref<1xi32, #tpu.memory_space<smem>>) -> (i32, i32) {
    %c0_i32 = arith.constant 0 : i32
    %c0_i32_0 = arith.constant 0 : i32
    return %c0_i32, %arg0 : i32, i32
  }
  func.func @transform_2(%arg0: i32, %arg1: memref<1xi32, #tpu.memory_space<smem>>) -> (i32, i32) {
    %c0_i32 = arith.constant 0 : i32
    %c0_i32_0 = arith.constant 0 : i32
    return %c0_i32, %arg0 : i32, i32
  }
  func.func @transform_3(%arg0: i32, %arg1: memref<1xi32, #tpu.memory_space<smem>>) -> (i32, i32) {
    %c0_i32 = arith.constant 0 : i32
    %c0_i32_0 = arith.constant 0 : i32
    %c0_i32_1 = arith.constant 0 : i32
    return %c0_i32, %c0_i32_0 : i32, i32
  }
  func.func @transform_4(%arg0: i32, %arg1: memref<1xi32, #tpu.memory_space<smem>>) -> (i32, i32, i32) {
    %c0_i32 = arith.constant 0 : i32
    %c0_i32_0 = arith.constant 0 : i32
    %c0_i32_1 = arith.constant 0 : i32
    return %arg0, %c0_i32, %c0_i32_0 : i32, i32, i32
  }
}

</mosaic_0001>

<bundles_post_ra>
// kernel: _freloss_device.1
= control target key start
LH: loop header
LB: loop body
LE: loop exit
PB: predicated region body
PF: predicated region fallthrough
CT: control target
= control target key end

     0   :  { %s1455_s0 = inlined_call_operand.<no memory space> [shape: s32[1], index: 0, kind: input, shape index: {}]   ;;  %s1456_s1 = inlined_call_operand.vmem [shape: f32[1,128], index: 1, kind: input, shape index: {}]   ;;  %s1457_s2 = inlined_call_operand.vmem [shape: f32[32,64], index: 2, kind: input, shape index: {}]   ;;  %s1458_s3 = inlined_call_operand.vmem [shape: f32[32,64], index: 3, kind: input, shape index: {}]   ;;  %s1459_s4 = inlined_call_operand.vmem [shape: f32[48,32], index: 4, kind: input, shape index: {}]   ;;  %s1460_s5 = inlined_call_operand.vmem [shape: f32[1,1,128], index: 5, kind: output, shape index: {}]  }
   0x1   :  { %10 = sst [smem:[#allocation3]] %s1455_s0  ;;  %p675_p0 = scmp.ne.s32.totalorder %s1455_s0, 0 }
   0x2   :  { %v807_v0 = vmov (!%p675_p0), 0.0  }
   0x3   :  { %23 = sbr.rel (%p675_p0) target bundleno = 10 (0xa), region = 21  ;;  %24 = vst [vmem:[%s1460_s5] sm:$0x1] (!%p675_p0), %v807_v0 }
   0xa PF:  { %s25_s24 = sld [smem:[#allocation3]] }
  0x10   :  { %p676_p1 = scmp.eq.s32.totalorder %s25_s24, 0 }
  0x12   :  { %29 = sbr.rel (%p676_p1) target bundleno = 580 (0x244), region = 25 }
  0x19   :  { %v36_v1 = vld [vmem:[%s1456_s1] sm:$0x1]  ;;  %v1463_v2 = vlaneseq  ;;  %vm60_vm1 = vcmask 261120   ;;  %v39_v4 = vld [vmem:[%s1457_s2 + $0x8] sm:$0xff]  ;;  %v808_v6 = vmov 0   ;;  %v40_v12 = vld [vmem:[%s1457_s2 + $0x10] sm:$0xff] }
  0x1a   :  { %vm37_vm0 = vcmp.gt.f32.partialorder %v36_v1, 0.0  ;;  %v38_v3 = vld [vmem:[%s1457_s2] sm:$0xff]  ;;  %v43_v9 = vld [vmem:[%s1458_s3 + $0x8] sm:$0xff]  ;;  %v41_v13 = vld [vmem:[%s1457_s2 + $0x18] sm:$0xff]  ;;  %v1464_v57 = vmov 0.0  }
  0x1b   :  { %v48_v5 = vshrl.u32 %v1463_v2, 7  ;;  %v46_v7 = vsel %vm37_vm0, 1, %v808_v6  ;;  %v42_v8 = vld [vmem:[%s1458_s3] sm:$0xff]  ;;  %v44_v14 = vld [vmem:[%s1458_s3 + $0x10] sm:$0xff]  ;;  %v45_v15 = vld [vmem:[%s1458_s3 + $0x18] sm:$0xff]  ;;  %v751_v17 = vpack.c.bf16 %v39_v4, %v38_v3  ;;  %v757_v19 = vpack.c.bf16 %v41_v13, %v40_v12 }
  0x1c   :  { %v30_v10 = vld [vmem:[%s1459_s4] sm:$0xff]  ;;  %v763_v18 = vpack.c.bf16 %v43_v9, %v42_v8  ;;  %v769_v20 = vpack.c.bf16 %v45_v15, %v44_v14  ;;  %v31_v21 = vld [vmem:[%s1459_s4 + $0x8] sm:$0xff]  ;;  %v32_v22 = vld [vmem:[%s1459_s4 + $0x10] sm:$0xff]  ;;  %v1466_v63 = vmov 0.7853982   ;;  %v1501_v15 = vmov 0 }
  0x1d   :  { %v49_v11 = vsub.s32 0, %v48_v5  ;;  %725 = vmatprep.mubr.msk.f32.mxu0 %vm60_vm1, %v30_v10  ;;  %742 = vmatprep.mubr.msk.f32.mxu1 %vm60_vm1, %v30_v10  ;;  %v33_v23 = vld [vmem:[%s1459_s4 + $0x18] sm:$0xff]  ;;  %v34_v24 = vld [vmem:[%s1459_s4 + $0x20] sm:$0xff]  ;;  %v35_v25 = vld [vmem:[%s1459_s4 + $0x28] sm:$0xff] }
  0x1f   :  { %v50_v16 = vrot.slane %v46_v7, %v49_v11 }
  0x21   :  { %vm51_vm2 = vcmp.eq.s32.totalorder %v50_v16, 1 }
  0x22   :  { %vm752_vm3 = vmpackc.low %vm51_vm2, %vm51_vm2 }
  0x23   :  { %753 = vmatprep.subr.msk.bf16.mxu0 %vm752_vm3, %v751_v17  ;;  %765 = vmatprep.subr.msk.bf16.mxu1 %vm752_vm3, %v763_v18 }
  0x24   :  { %756 = vmatpush3.bf16.msk.msra.mxu0 %vm752_vm3, %v751_v17  ;;  %768 = vmatpush3.bf16.msk.msra.mxu1 %vm752_vm3, %v763_v18  ;;  %v1504_v18 = vmov 0 }
  0x25   :  { %759 = vmatprep.subr.msk.bf16.mxu0 %vm752_vm3, %v757_v19  ;;  %771 = vmatprep.subr.msk.bf16.mxu1 %vm752_vm3, %v769_v20 }
  0x28   :  { %762 = vmatpush3.bf16.msk.msra.mxu0 %vm752_vm3, %v757_v19  ;;  %774 = vmatpush3.bf16.msk.msra.mxu1 %vm752_vm3, %v769_v20 }
  0x2b   :  { %726 = vmatmul.mubr.msk.f32.vlgmr.msra.gmra.mrb[0].mxu0 %vm60_vm1, %v31_v21  ;;  %743 = vmatmul.mubr.msk.f32.vlgmr.msra.gmra.mrb[0].mxu1 %vm60_vm1, %v31_v21 }
  0x2c   :  { %728 = vmatprep.mubr.msk.f32.mxu0 %vm60_vm1, %v32_v22  ;;  %745 = vmatprep.mubr.msk.f32.mxu1 %vm60_vm1, %v32_v22 }
  0x2f   :  { %729 = vmatmul.mubr.msk.f32.gmra.mrb[2].mxu0 %vm60_vm1, %v33_v23  ;;  %746 = vmatmul.mubr.msk.f32.gmra.mrb[2].mxu1 %vm60_vm1, %v33_v23  ;;  %v1507_v23 = vmov 0 }
  0x30   :  { %731 = vmatprep.mubr.msk.f32.mxu0 %vm60_vm1, %v34_v24  ;;  %748 = vmatprep.mubr.msk.f32.mxu1 %vm60_vm1, %v34_v24 }
  0x33   :  { %732 = vmatmul.mubr.msk.f32.gmra.mrb[4].mxu0 %vm60_vm1, %v35_v25  ;;  %749 = vmatmul.mubr.msk.f32.gmra.mrb[4].mxu1 %vm60_vm1, %v35_v25 }
  0xfe   :  { %v908_v26 = vpop.f32.mrb[0].mxu0  ;;  %v910_v27 = vpop.f32.mrb[0].mxu1 }
  0xff   :  { %v912_v28 = vpop.f32.mrb[1].mxu0  ;;  %v914_v29 = vpop.f32.mrb[1].mxu1  ;;  %v922_v32 = vmul.f32 %v908_v26, %v908_v26  ;;  %vm412_vm4 = vcmp.lt.s32.totalorder %v908_v26, 0  ;;  %v998_v56 = vand.u32 2147483647, %v908_v26  ;;  %v1011_v59 = vmul.f32 %v910_v27, %v910_v27 }
 0x100   :  { %v269_v33 = vmul.f32 %v912_v28, %v912_v28  ;;  %v928_v34 = vand.u32 2147483647, %v912_v28  ;;  %vm1462_vm5 = vcmp.lt.f32.partialorder %v912_v28, 0.0  ;;  %vm365_vm6 = vcmp.lt.s32.totalorder %v912_v28, 0 }
 0x101   :  { %vm369_vm7 = vcmp.ne.f32.partialorder %v912_v28, %v912_v28  ;;  %v299_v39 = vmul.f32 %v914_v29, %v914_v29  ;;  %v946_v40 = vand.u32 2147483647, %v914_v29  ;;  %vm1461_vm13 = vcmp.lt.f32.partialorder %v914_v29, 0.0  ;;  %1496 = vst [vmem:[#allocation7_spill] sm:$0xff] %v998_v56 }
 0x102   :  { %v916_v30 = vpop.f32.mrb[2].mxu0  ;;  %v918_v31 = vpop.f32.mrb[2].mxu1  ;;  %vm375_vm11 = vcmp.eq.s32.totalorder %v928_v34, inf  ;;  %vm506_vm14 = vcmp.lt.s32.totalorder %v914_v29, 0  ;;  %vm510_vm15 = vcmp.ne.f32.partialorder %v914_v29, %v914_v29  ;;  %v1007_v58 = vsel %vm412_vm4, 3.1415927, %v1464_v57 }
 0x103   :  { %v930_v35 = vpop.f32.mrb[3].mxu0  ;;  %v932_v36 = vpop.f32.mrb[3].mxu1  ;;  %v272_v37 = vmul.f32 %v916_v30, %v916_v30  ;;  %v939_v38 = vand.u32 2147483647, %v916_v30  ;;  %vm370_vm8 = vcmp.ne.f32.partialorder %v916_v30, %v916_v30  ;;  %v302_v49 = vmul.f32 %v918_v31, %v918_v31  ;;  %1497 = vst [vmem:[#allocation8_spill] sm:$0xff] %v1007_v58 }
 0x104   :  { %vm962_vm10 = vmor %vm369_vm7, %vm370_vm8  ;;  %v975_v50 = vand.u32 2147483647, %v918_v31  ;;  %vm511_vm1 = vcmp.ne.f32.partialorder %v918_v31, %v918_v31  ;;  %vm516_vm7 = vcmp.eq.s32.totalorder %v946_v40, inf  ;;  %v1014_v60 = vand.u32 2147483647, %v910_v27 }
 0x105   :  { %v954_v43 = vadd.f32 %v272_v37, %v269_v33  ;;  %v337_v44 = vmin.f32 %v928_v34, %v939_v38  ;;  %v338_v45 = vmax.f32 %v928_v34, %v939_v38  ;;  %vm376_vm12 = vcmp.eq.s32.totalorder %v939_v38, inf  ;;  %vm993_vm2 = vmor %vm510_vm15, %vm511_vm1 }
 0x106   :  { %v950_v41 = vpop.f32.mrb[4].mxu0  ;;  %v952_v42 = vpop.f32.mrb[4].mxu1  ;;  %vm981_vm0 = vmand %vm375_vm11, %vm376_vm12  ;;  %v987_v52 = vadd.f32 %v302_v49, %v299_v39  ;;  %v478_v53 = vmin.f32 %v946_v40, %v975_v50  ;;  %v479_v54 = vmax.f32 %v946_v40, %v975_v50  ;;  %vm517_vm8 = vcmp.eq.s32.totalorder %v975_v50, inf  ;;  %1498 = vst [vmem:[#allocation9_spill] sm:$0xff] %v1014_v60 }
 0x107   :  { %1487 = vst [vmem:[#allocation4_spill] sm:$0xff] %v952_v42  ;;  %v966_v47 = vpop.f32.mrb[5].mxu0  ;;  %v968_v48 = vpop.f32.mrb[5].mxu1  ;;  %783 = vrcp.f32 %v338_v45  ;;  %v1019_v61 = vsel %vm365_vm6, 3.1415927, %v1464_v57  ;;  %vm1021_vm11 = vmand %vm516_vm7, %vm517_vm8  ;;  %v271_v7 = vmul.f32 %v930_v35, %v930_v35  ;;  %v274_v9 = vmul.f32 %v950_v41, %v950_v41 }
 0x108   :  { %1490 = vst [vmem:[#allocation5_spill] sm:$0xff] %v966_v47  ;;  %1491 = vst [vmem:[#allocation6_spill] sm:$0xff] %v968_v48  ;;  %v1028_v0 = vsel %vm1462_vm5, 2.3561945, %v1466_v63  ;;  %v1033_v1 = vsel %vm506_vm14, 3.1415927, %v1464_v57  ;;  %785 = vrcp.f32 %v479_v54  ;;  %vm463_vm4 = vcmp.ne.f32.partialorder %v930_v35, %v930_v35 }
 0x109   :  { %v1038_v3 = vsel %vm1461_vm13, 2.3561945, %v1466_v63  ;;  %787 = vrsqrt.f32 %v954_v43  ;;  %v1044_v6 = vand.u32 2147483647, %v930_v35  ;;  %v1049_v8 = vand.u32 2147483647, %v932_v36 }
 0x10a   :  { %v1054_v10 = vand.u32 2147483647, %v950_v41  ;;  %789 = vrsqrt.f32 %v987_v52  ;;  %v301_v11 = vmul.f32 %v932_v36, %v932_v36  ;;  %vm464_vm6 = vcmp.ne.f32.partialorder %v950_v41, %v950_v41 }
 0x10b   :  { %v1063_v12 = vadd.f32 %v274_v9, %v271_v7  ;;  %vm1071_vm14 = vmor %vm463_vm4, %vm464_vm6  ;;  %vm469_vm15 = vcmp.eq.s32.totalorder %v1044_v6, inf  ;;  %v304_v16 = vmul.f32 %v952_v42, %v952_v42  ;;  %v1080_v17 = vand.u32 2147483647, %v952_v42 }
 0x10c   :  { %v431_v13 = vmin.f32 %v1044_v6, %v1054_v10  ;;  %v432_v14 = vmax.f32 %v1044_v6, %v1054_v10  ;;  %v1502_v15 = vsel %vm1071_vm14, 4294967295, %v1501_v15  ;;  %vm470_vm1 = vcmp.eq.s32.totalorder %v1054_v10, inf }
 0x10d   :  { %1503 = vst [vmem:[#allocation10_spill] sm:$0xff] %v1502_v15  ;;  %vm1468_vm7 = vcmp.lt.f32.partialorder %v930_v35, 0.0  ;;  %vm604_vm8 = vcmp.ne.f32.partialorder %v932_v36, %v932_v36  ;;  %vm1085_vm12 = vmand %vm469_vm15, %vm470_vm1  ;;  %vm605_vm4 = vcmp.ne.f32.partialorder %v952_v42, %v952_v42  ;;  %vm610_vm6 = vcmp.eq.s32.totalorder %v1049_v8, inf }
 0x10e   :  { %v1505_v18 = vsel %vm1085_vm12, 4294967295, %v1504_v18  ;;  %791 = vrcp.f32 %v432_v14  ;;  %v1092_v20 = vadd.f32 %v304_v16, %v301_v11  ;;  %v573_v22 = vmax.f32 %v1049_v8, %v1080_v17  ;;  %vm1098_vm13 = vmor %vm604_vm8, %vm605_vm4 }
 0x10f   :  { %1506 = vst [vmem:[#allocation11_spill] sm:$0xff] %v1505_v18  ;;  %v1508_v23 = vsel %vm1098_vm13, 4294967295, %v1507_v23  ;;  %vm611_vm1 = vcmp.eq.s32.totalorder %v1080_v17, inf  ;;  %v273_v25 = vmul.f32 %v966_v47, %v966_v47  ;;  %vm459_vm3 = vcmp.lt.s32.totalorder %v930_v35, 0 }
 0x110   :  { %1509 = vst [vmem:[#allocation12_spill] sm:$0xff] %v1508_v23  ;;  %793 = vrsqrt.f32 %v1063_v12  ;;  %vm1114_vm8 = vmand %vm610_vm6, %vm611_vm1  ;;  %v1510_v33 = vmov 0  ;;  %v1119_v37 = vand.u32 2147483647, %v966_v47  ;;  %vm416_vm4 = vcmp.ne.f32.partialorder %v908_v26, %v908_v26 }
 0x111   :  { %v784_v19 = vpop.eup %783  ;;  %v1511_v33 = vsel %vm1114_vm8, 4294967295, %v1510_v33  ;;  %795 = vrcp.f32 %v573_v22  ;;  %v1128_v45 = vadd.f32 %v273_v25, %v922_v32  ;;  %vm417_vm6 = vcmp.ne.f32.partialorder %v966_v47, %v966_v47 }
 0x112   :  { %v1105_v24 = vmul.f32 %v784_v19, %v337_v44  ;;  %1512 = vst [vmem:[#allocation13_spill] sm:$0xff] %v1511_v33  ;;  %1513 = vst [vmem:[#allocation14_spill] sm:$0xff] %v1119_v37  ;;  %v786_v39 = vpop.eup %785  ;;  %v385_v9 = vmax.f32 %v998_v56, %v1119_v37  ;;  %v1514_v32 = vmov 0  ;;  %vm422_vm5 = vcmp.eq.s32.totalorder %v998_v56, inf }
 0x113   :  { %v788_v49 = vpop.eup %787  ;;  %v1135_v54 = vmul.f32 %v786_v39, %v478_v53  ;;  %vm1143_vm15 = vmor %vm416_vm4, %vm417_vm6  ;;  %797 = vrsqrt.f32 %v1128_v45  ;;  %vm423_vm9 = vcmp.eq.s32.totalorder %v1119_v37, inf  ;;  %v1160_v16 = vsel %vm459_vm3, 3.1415927, %v1464_v57 }
 0x114   :  { %v1125_v44 = vmul.f32 %v1105_v24, %v1105_v24  ;;  %v1515_v32 = vsel %vm1143_vm15, 4294967295, %v1514_v32  ;;  %v1151_v53 = vpop.eup %789  ;;  %1517 = vst [vmem:[#allocation16_spill] sm:$0xff] %v1160_v16  ;;  %799 = vrcp.f32 %v385_v9  ;;  %vm1162_vm4 = vmand %vm422_vm5, %vm423_vm9  ;;  %v1518_v19 = vmov 0 }
 0x115   :  { %1516 = vst [vmem:[#allocation15_spill] sm:$0xff] %v1515_v32  ;;  %v1155_v14 = vmul.f32 %v1135_v54, %v1135_v54  ;;  %v1519_v19 = vsel %vm1162_vm4, 4294967295, %v1518_v19  ;;  %v303_v22 = vmul.f32 %v968_v48, %v968_v48  ;;  %v1171_v39 = vsel %vm1468_vm7, 2.3561945, %v1466_v63 }
 0x116   :  { %v342_v11 = vmul.f32 0.002785687, %v1125_v44  ;;  %1520 = vst [vmem:[#allocation17_spill] sm:$0xff] %v1519_v19  ;;  %1521 = vst [vmem:[#allocation18_spill] sm:$0xff] %v1171_v39  ;;  %801 = vrsqrt.f32 %v1092_v20  ;;  %v1175_v2 = vand.u32 2147483647, %v968_v48  ;;  %vm557_vm5 = vcmp.ne.f32.partialorder %v910_v27, %v910_v27 }
 0x117   :  { %v483_v9 = vmul.f32 0.002785687, %v1155_v14  ;;  %v1179_v57 = vadd.f32 %v303_v22, %v1011_v59  ;;  %vm558_vm9 = vcmp.ne.f32.partialorder %v968_v48, %v968_v48  ;;  %v1523_v59 = vmov 0 }
 0x118   :  { %v343_v25 = vadd.f32 -0.015866, %v342_v11  ;;  %1522 = vst [vmem:[#allocation19_spill] sm:$0xff] %v1175_v2  ;;  %v526_v5 = vmax.f32 %v1014_v60, %v1175_v2  ;;  %vm1192_vm6 = vmor %vm557_vm5, %vm558_vm9  ;;  %v792_v22 = vpop.eup %791  ;;  %vm563_vm1 = vcmp.eq.s32.totalorder %v1014_v60, inf  ;;  %vm564_vm7 = vcmp.eq.s32.totalorder %v1175_v2, inf }
 0x119   :  { %v1524_v59 = vsel %vm1192_vm6, 4294967295, %v1523_v59  ;;  %v484_v4 = vadd.f32 -0.015866, %v483_v9  ;;  %803 = vrsqrt.f32 %v1179_v57  ;;  %v1202_v63 = vmul.f32 %v792_v22, %v431_v13  ;;  %vm1204_vm3 = vmand %vm563_vm1, %vm564_vm7 }
 0x11a   :  { %v344_v11 = vmul.f32 %v343_v25, %v1125_v44  ;;  %1525 = vst [vmem:[#allocation20_spill] sm:$0xff] %v1524_v59  ;;  %805 = vrcp.f32 %v526_v5  ;;  %v1526_v7 = vmov 0  ;;  %v279_v21 = vmul.f32 %v788_v49, %v954_v43  ;;  %v794_v9 = vpop.eup %793 }
 0x11b   :  { %v1527_v7 = vsel %vm1204_vm3, 4294967295, %v1526_v7  ;;  %v485_v59 = vmul.f32 %v484_v4, %v1155_v14  ;;  %vm280_vm5 = vcmp.eq.f32.partialorder %v954_v43, inf  ;;  %vm282_vm9 = vcmp.eq.f32.partialorder %v954_v43, 0.0  ;;  %v796_v48 = vpop.eup %795 }
 0x11c   :  { %v345_v25 = vadd.f32 0.04247222, %v344_v11  ;;  %1528 = vst [vmem:[#allocation21_spill] sm:$0xff] %v1527_v7  ;;  %v283_v11 = vand.u32 2147483648, %v954_v43  ;;  %v1216_v5 = vmul.f32 %v1202_v63, %v1202_v63  ;;  %v281_v22 = vsel %vm280_vm5, %v954_v43, %v279_v21 }
 0x11d   :  { %vm287_vm7 = vcmp.eq.f32.partialorder %v1128_v45, inf  ;;  %v486_v49 = vadd.f32 0.04247222, %v485_v59  ;;  %v1529_v4 = vmin.f32 %v1049_v8, %v1080_v17  ;;  %vm289_vm1 = vcmp.eq.f32.partialorder %v1128_v45, 0.0  ;;  %v798_v32 = vpop.eup %797 }
 0x11e   :  { %v346_v13 = vmul.f32 %v345_v25, %v1125_v44  ;;  %v1225_v19 = vsel %vm282_vm9, %v283_v11, %v281_v22  ;;  %v436_v58 = vmul.f32 0.002785687, %v1216_v5  ;;  %v290_v33 = vand.u32 2147483648, %v1128_v45  ;;  %v800_v21 = vpop.eup %799 }
 0x11f   :  { %v1223_v7 = vmul.f32 %v796_v48, %v1529_v4  ;;  %v293_v43 = vmul.f32 %v794_v9, %v1063_v12  ;;  %v487_v59 = vmul.f32 %v486_v49, %v1155_v14  ;;  %v286_v48 = vmul.f32 %v798_v32, %v1128_v45 }
 0x120   :  { %v347_v25 = vadd.f32 -0.074975304, %v346_v13  ;;  %vm294_vm5 = vcmp.eq.f32.partialorder %v1063_v12, inf  ;;  %v1238_v11 = vpop.eup %801  ;;  %v437_v22 = vadd.f32 -0.015866, %v436_v58  ;;  %v1530_v4 = vmin.f32 %v998_v56, %v1119_v37 }
 0x121   :  { %v1234_v47 = vmul.f32 %v1223_v7, %v1223_v7  ;;  %v295_v49 = vsel %vm294_vm5, %v1063_v12, %v293_v43  ;;  %v488_v23 = vadd.f32 -0.074975304, %v487_v59  ;;  %v288_v32 = vsel %vm287_vm7, %v1128_v45, %v286_v48 }
 0x122   :  { %v348_v13 = vmul.f32 %v347_v25, %v1125_v44  ;;  %v1244_v9 = vmul.f32 %v800_v21, %v1530_v4  ;;  %vm296_vm9 = vcmp.eq.f32.partialorder %v1063_v12, 0.0  ;;  %v438_v25 = vmul.f32 %v437_v22, %v1216_v5 }
 0x123   :  { %v577_v42 = vmul.f32 0.002785687, %v1234_v47  ;;  %v1259_v21 = vsel %vm289_vm1, %v290_v33, %v288_v32  ;;  %v804_v43 = vpop.eup %803  ;;  %v489_v59 = vmul.f32 %v488_v23, %v1155_v14  ;;  %v297_v56 = vand.u32 2147483648, %v1063_v12 }
 0x124   :  { %v349_v18 = vadd.f32 0.1064488, %v348_v13  ;;  %v1255_v58 = vmul.f32 %v1244_v9, %v1244_v9  ;;  %v309_v48 = vmul.f32 %v1151_v53, %v987_v52  ;;  %v806_v13 = vpop.eup %805  ;;  %v439_v37 = vadd.f32 0.04247222, %v438_v25 }
 0x125   :  { %v578_v4 = vadd.f32 -0.015866, %v577_v42  ;;  %vm310_vm7 = vcmp.eq.f32.partialorder %v987_v52, inf  ;;  %v490_v45 = vadd.f32 0.1064488, %v489_v59  ;;  %v1531_v23 = vmin.f32 %v1014_v60, %v1175_v2 }
 0x126   :  { %v350_v22 = vmul.f32 %v349_v18, %v1125_v44  ;;  %v389_v39 = vmul.f32 0.002785687, %v1255_v58  ;;  %v1276_v32 = vsel %vm296_vm9, %v297_v56, %v295_v49  ;;  %v440_v18 = vmul.f32 %v439_v37, %v1216_v5 }
 0x127   :  { %v579_v33 = vmul.f32 %v578_v4, %v1234_v47  ;;  %v1272_v42 = vmul.f32 %v806_v13, %v1531_v23  ;;  %v311_v15 = vsel %vm310_vm7, %v987_v52, %v309_v48  ;;  %v491_v16 = vmul.f32 %v490_v45, %v1155_v14 }
 0x128   :  { %v351_v53 = vadd.f32 -0.14207031, %v350_v22  ;;  %v390_v25 = vadd.f32 -0.015866, %v389_v39  ;;  %vm312_vm1 = vcmp.eq.f32.partialorder %v987_v52, 0.0  ;;  %v313_v49 = vand.u32 2147483648, %v987_v52 }
 0x129   :  { %v580_v59 = vadd.f32 0.04247222, %v579_v33  ;;  %v1283_v4 = vmul.f32 %v1272_v42, %v1272_v42  ;;  %v441_v12 = vadd.f32 -0.074975304, %v440_v18  ;;  %v492_v37 = vadd.f32 -0.14207031, %v491_v16 }
 0x12a   :  { %v352_v13 = vmul.f32 %v351_v53, %v1125_v44  ;;  %v391_v56 = vmul.f32 %v390_v25, %v1255_v58  ;;  %v316_v22 = vmul.f32 %v804_v43, %v1179_v57  ;;  %v1293_v60 = vsel %vm312_vm1, %v313_v49, %v311_v15 }
 0x12b   :  { %v581_v39 = vmul.f32 %v580_v59, %v1234_v47  ;;  %v530_v48 = vmul.f32 0.002785687, %v1283_v4  ;;  %v442_v33 = vmul.f32 %v441_v12, %v1216_v5  ;;  %v493_v53 = vmul.f32 %v492_v37, %v1155_v14 }
 0x12c   :  { %v353_v45 = vadd.f32 0.19993454, %v352_v13  ;;  %v392_v23 = vadd.f32 0.04247222, %v391_v56  ;;  %vm317_vm5 = vcmp.eq.f32.partialorder %v1179_v57, inf  ;;  %vm319_vm9 = vcmp.eq.f32.partialorder %v1179_v57, 0.0 }
 0x12d   :  { %v582_v18 = vadd.f32 -0.074975304, %v581_v39  ;;  %v531_v2 = vadd.f32 -0.015866, %v530_v48  ;;  %v443_v16 = vadd.f32 0.1064488, %v442_v33  ;;  %v318_v59 = vsel %vm317_vm5, %v1179_v57, %v316_v22 }
 0x12e   :  { %v354_v52 = vmul.f32 %v353_v45, %v1125_v44  ;;  %v393_v25 = vmul.f32 %v392_v23, %v1255_v58  ;;  %v494_v43 = vadd.f32 0.19993454, %v493_v53  ;;  %v320_v37 = vand.u32 2147483648, %v1179_v57 }
 0x12f   :  { %v583_v13 = vmul.f32 %v582_v18, %v1234_v47  ;;  %v532_v12 = vmul.f32 %v531_v2, %v1283_v4  ;;  %v444_v56 = vmul.f32 %v443_v16, %v1216_v5  ;;  %v323_v22 = vmul.f32 %v1238_v11, %v1092_v20 }
 0x130   :  { %v355_v15 = vadd.f32 -0.33333147, %v354_v52  ;;  %v394_v49 = vadd.f32 -0.074975304, %v393_v25  ;;  %v495_v39 = vmul.f32 %v494_v43, %v1155_v14  ;;  %v321_v53 = vsel %vm319_vm9, %v320_v37, %v318_v59 }
 0x131   :  { %v584_v48 = vadd.f32 0.1064488, %v583_v13  ;;  %v533_v45 = vadd.f32 0.04247222, %v532_v12  ;;  %v445_v23 = vadd.f32 -0.14207031, %v444_v56 }
 0x132   :  { %v356_v33 = vmul.f32 %v355_v15, %v1125_v44  ;;  %v395_v2 = vmul.f32 %v394_v49, %v1255_v58  ;;  %v496_v18 = vadd.f32 -0.33333147, %v495_v39  ;;  %vm324_vm7 = vcmp.eq.f32.partialorder %v1092_v20, inf }
 0x133   :  { %v585_v52 = vmul.f32 %v584_v48, %v1234_v47  ;;  %v534_v16 = vmul.f32 %v533_v45, %v1283_v4  ;;  %v446_v25 = vmul.f32 %v445_v23, %v1216_v5  ;;  %v325_v11 = vsel %vm324_vm7, %v1092_v20, %v323_v22 }
 0x134   :  { %v357_v57 = vmul.f32 %v356_v33, %v1105_v24  ;;  %v396_v43 = vadd.f32 0.1064488, %v395_v2  ;;  %vm367_vm1 = vcmp.eq.f32.partialorder %v916_v30, 0.0  ;;  %v497_v44 = vmul.f32 %v496_v18, %v1155_v14 }
 0x135   :  { %v586_v13 = vadd.f32 -0.14207031, %v585_v52  ;;  %v535_v59 = vadd.f32 -0.074975304, %v534_v16  ;;  %vm326_vm5 = vcmp.eq.f32.partialorder %v1092_v20, 0.0  ;;  %v327_v49 = vand.u32 2147483648, %v1092_v20 }
 0x136   :  { %v358_v12 = vadd.f32 %v357_v57, %v1105_v24  ;;  %v447_v15 = vadd.f32 0.19993454, %v446_v25  ;;  %v397_v56 = vmul.f32 %v396_v43, %v1255_v58  ;;  %v498_v37 = vmul.f32 %v497_v44, %v1135_v54 }
 0x137   :  { %v587_v39 = vmul.f32 %v586_v13, %v1234_v47  ;;  %v536_v48 = vmul.f32 %v535_v59, %v1283_v4  ;;  %v329_v14 = vsub.f32 %v1225_v19, %v1293_v60  ;;  %v328_v33 = vsel %vm326_vm5, %v327_v49, %v325_v11 }
 0x138   :  { %v360_v45 = vsub.f32 1.5707964, %v358_v12  ;;  %v448_v22 = vmul.f32 %v447_v15, %v1216_v5  ;;  %v398_v24 = vadd.f32 -0.14207031, %v397_v56  ;;  %v499_v23 = vadd.f32 %v498_v37, %v1135_v54 }
 0x139   :  { %v588_v2 = vadd.f32 0.19993454, %v587_v39  ;;  %v537_v20 = vadd.f32 0.1064488, %v536_v48  ;;  %v330_v18 = vsub.f32 %v1259_v21, %v321_v53  ;;  %vm1532_vm7 = vcmp.gt.f32.partialorder %v939_v38, %v928_v34 }
 0x13a   :  { %v361_v52 = vsel %vm1532_vm7, %v360_v45, %v358_v12  ;;  %v449_v16 = vadd.f32 -0.33333147, %v448_v22  ;;  %v399_v60 = vmul.f32 %v398_v24, %v1255_v58  ;;  %v331_v19 = vsub.f32 %v1276_v32, %v328_v33 }
 0x13b   :  { %v363_v57 = vsub.f32 3.1415927, %v361_v52  ;;  %v501_v25 = vsub.f32 1.5707964, %v499_v23  ;;  %vm600_vm9 = vcmp.lt.s32.totalorder %v932_v36, 0  ;;  %v589_v43 = vmul.f32 %v588_v2, %v1234_v47 }
 0x13c   :  { %v538_v54 = vmul.f32 %v537_v20, %v1283_v4  ;;  %v450_v11 = vmul.f32 %v449_v16, %v1216_v5  ;;  %v400_v21 = vadd.f32 0.19993454, %v399_v60  ;;  %v332_v53 = vand.u32 2147483647, %v329_v14 }
 0x13d   :  { %v333_v44 = vand.u32 2147483647, %v330_v18  ;;  %vm1533_vm5 = vcmp.lt.f32.partialorder %v912_v28, 0.0  ;;  %vm1534_vm7 = vcmp.gt.f32.partialorder %v975_v50, %v946_v40  ;;  %v590_v32 = vadd.f32 -0.33333147, %v589_v43 }
 0x13e   :  { %v364_v34 = vsel %vm1533_vm5, %v363_v57, %v361_v52  ;;  %v502_v38 = vsel %vm1534_vm7, %v501_v25, %v499_v23  ;;  %v539_v13 = vadd.f32 -0.14207031, %v538_v54  ;;  %v451_v15 = vmul.f32 %v450_v11, %v1202_v63  ;;  %v1543_v57 = vld [vmem:[#allocation16_spill] sm:$0xff] }
 0x13f   :  { %v368_v59 = vsel %vm367_vm1, %v1019_v61, %v364_v34  ;;  %v504_v12 = vsub.f32 3.1415927, %v502_v38  ;;  %v401_v5 = vmul.f32 %v400_v21, %v1255_v58  ;;  %v591_v28 = vmul.f32 %v590_v32, %v1234_v47  ;;  %v1547_v34 = vld [vmem:[#allocation4_spill] sm:$0xff]  ;;  %v1549_v32 = vld [vmem:[#allocation7_spill] sm:$0xff] }
 0x140   :  { %v372_v56 = vsel %vm962_vm10, nan, %v368_v59  ;;  %v540_v49 = vmul.f32 %v539_v13, %v1283_v4  ;;  %v334_v40 = vand.u32 2147483647, %v331_v19  ;;  %vm1535_vm5 = vcmp.lt.f32.partialorder %v914_v29, 0.0 }
 0x141   :  { %v378_v50 = vsel %vm981_vm0, %v1028_v0, %v372_v56  ;;  %v505_v61 = vsel %vm1535_vm5, %v504_v12, %v502_v38  ;;  %v452_v37 = vadd.f32 %v451_v15, %v1202_v63  ;;  %v402_v39 = vadd.f32 -0.33333147, %v401_v5  ;;  %v1548_v38 = vld [vmem:[#allocation14_spill] sm:$0xff] }
 0x142   :  { %v379_v48 = vand.u32 2147483647, %v378_v50  ;;  %vm1536_vm1 = vcmp.eq.f32.partialorder %v918_v31, 0.0  ;;  %vm597_vm10 = vcmp.lt.f32.partialorder %v932_v36, 0.0  ;;  %v592_v47 = vmul.f32 %v591_v28, %v1223_v7 }
 0x143   :  { %v509_v46 = vsel %vm1536_vm1, %v1033_v1, %v505_v61  ;;  %v541_v14 = vadd.f32 0.19993454, %v540_v49  ;;  %v454_v0 = vsub.f32 1.5707964, %v452_v37  ;;  %v403_v29 = vmul.f32 %v402_v39, %v1255_v58 }
 0x144   :  { %v513_v51 = vsel %vm993_vm2, nan, %v509_v46  ;;  %v623_v45 = vadd.f32 %v333_v44, %v332_v53  ;;  %v1537_v63 = vand.u32 2147483648, %v916_v30  ;;  %v593_v24 = vadd.f32 %v592_v47, %v1223_v7  ;;  %v1545_v44 = vld [vmem:[#allocation18_spill] sm:$0xff] }
 0x145   :  { %v519_v1 = vsel %vm1021_vm11, %v1038_v3, %v513_v51  ;;  %v542_v33 = vmul.f32 %v541_v14, %v1283_v4  ;;  %vm409_vm0 = vcmp.lt.f32.partialorder %v908_v26, 0.0  ;;  %vm1538_vm2 = vcmp.gt.f32.partialorder %v1054_v10, %v1044_v6  ;;  %v1555_v14 = vld [vmem:[#allocation8_spill] sm:$0xff] }
 0x146   :  { %v1370_v22 = vor.u32 %v1537_v63, %v379_v48  ;;  %v520_v55 = vand.u32 2147483647, %v519_v1  ;;  %v455_v58 = vsel %vm1538_vm2, %v454_v0, %v452_v37  ;;  %v404_v23 = vmul.f32 %v403_v29, %v1244_v9  ;;  %v1557_v63 = vld [vmem:[#allocation19_spill] sm:$0xff] }
 0x147   :  { %v624_v30 = vadd.f32 %v623_v45, %v334_v40  ;;  %v457_v2 = vsub.f32 3.1415927, %v455_v58  ;;  %v595_v20 = vsub.f32 1.5707964, %v593_v24  ;;  %v543_v18 = vadd.f32 -0.33333147, %v542_v33 }
 0x148   :  { %vm553_vm7 = vcmp.lt.s32.totalorder %v910_v27, 0  ;;  %v1539_v62 = vand.u32 2147483648, %v918_v31  ;;  %v1540_v7 = vmov 0.0   ;;  %v405_v16 = vadd.f32 %v404_v23, %v1244_v9  ;;  %v1553_v40 = vld [vmem:[#allocation5_spill] sm:$0xff] }
 0x149   :  { %v601_v52 = vsel %vm600_vm9, 3.1415927, %v1540_v7  ;;  %v625_v6 = vrot.slane %v624_v30, 4  ;;  %vm1541_vm11 = vcmp.lt.f32.partialorder %v930_v35, 0.0  ;;  %vm461_vm5 = vcmp.eq.f32.partialorder %v950_v41, 0.0 }
 0x14a   :  { %v1385_v3 = vor.u32 %v1539_v62, %v520_v55  ;;  %v458_v10 = vsel %vm1541_vm11, %v457_v2, %v455_v58  ;;  %vm1542_vm1 = vcmp.gt.f32.partialorder %v1080_v17, %v1049_v8  ;;  %v544_v31 = vmul.f32 %v543_v18, %v1283_v4  ;;  %v1561_v18 = vld [vmem:[#allocation6_spill] sm:$0xff] }
 0x14b   :  { %v596_v60 = vsel %vm1542_vm1, %v595_v20, %v593_v24  ;;  %v462_v25 = vsel %vm461_vm5, %v1543_v57, %v458_v10  ;;  %v407_v54 = vsub.f32 1.5707964, %v405_v16  ;;  %v474_v35 = vand.u32 2147483648, %v950_v41 }
 0x14c   :  { %v617_v19 = vsub.f32 %v1370_v22, %v1385_v3  ;;  %v598_v43 = vsub.f32 3.1415927, %v596_v60  ;;  %v466_v11 = vsel %vm1071_vm14, nan, %v462_v25  ;;  %v545_v21 = vmul.f32 %v544_v31, %v1272_v42  ;;  %v1558_v22 = vld [vmem:[#allocation9_spill] sm:$0xff] }
 0x14d   :  { %v626_v53 = vadd.f32 %v625_v6, %v624_v30  ;;  %v472_v17 = vsel %vm1085_vm12, %v1545_v44, %v466_v11  ;;  %vm602_vm9 = vcmp.eq.f32.partialorder %v1547_v34, 0.0  ;;  %vm1550_vm2 = vcmp.gt.f32.partialorder %v1548_v38, %v1549_v32 }
 0x14e   :  { %v599_v4 = vsel %vm597_vm10, %v598_v43, %v596_v60  ;;  %v408_v13 = vsel %vm1550_vm2, %v407_v54, %v405_v16  ;;  %v473_v59 = vand.u32 2147483647, %v472_v17  ;;  %v546_v41 = vadd.f32 %v545_v21, %v1272_v42 }
 0x14f   :  { %v603_v12 = vsel %vm602_vm9, %v601_v52, %v599_v4  ;;  %v410_v15 = vsub.f32 3.1415927, %v408_v13  ;;  %v1551_v5 = vmov 0.7853982   ;;  %vm414_vm12 = vcmp.eq.f32.partialorder %v1553_v40, 0.0 }
 0x150   :  { %v609_v56 = vsel %vm597_vm10, 2.3561945, %v1551_v5  ;;  %v607_v49 = vsel %vm1098_vm13, nan, %v603_v12  ;;  %v627_v50 = vrot.slane %v626_v53, 2  ;;  %v475_v61 = vor.u32 %v474_v35, %v473_v59 }
 0x151   :  { %v613_v39 = vsel %vm1114_vm8, %v609_v56, %v607_v49  ;;  %v411_v48 = vsel %vm409_vm0, %v410_v15, %v408_v13  ;;  %v548_v46 = vsub.f32 1.5707964, %v546_v41  ;;  %v615_v42 = vand.u32 2147483648, %v1547_v34 }
 0x152   :  { %v614_v47 = vand.u32 2147483647, %v613_v39  ;;  %v415_v36 = vsel %vm414_vm12, %v1555_v14, %v411_v48  ;;  %v628_v51 = vadd.f32 %v627_v50, %v626_v53  ;;  %v421_v0 = vsel %vm409_vm0, 2.3561945, %v1551_v5 }
 0x153   :  { %v419_v45 = vsel %vm1143_vm15, nan, %v415_v36  ;;  %vm1559_vm13 = vcmp.gt.f32.partialorder %v1557_v63, %v1558_v22  ;;  %vm644_vm14 = vcmask 1040384   ;;  %vm550_vm8 = vcmp.lt.f32.partialorder %v910_v27, 0.0 }
 0x154   :  { %v549_v1 = vsel %vm1559_vm13, %v548_v46, %v546_v41  ;;  %v616_v24 = vor.u32 %v615_v42, %v614_v47  ;;  %v425_v55 = vsel %vm1162_vm4, %v421_v0, %v419_v45  ;;  %v629_v23 = vrot.slane %v628_v51, 1 }
 0x155   :  { %v551_v58 = vsub.f32 3.1415927, %v549_v1  ;;  %v554_v26 = vsel %vm553_vm7, 3.1415927, %v1540_v7  ;;  %v426_v30 = vand.u32 2147483647, %v425_v55  ;;  %v1564_v39 = vlaneseq }
 0x156   :  { %v427_v2 = vand.u32 2147483648, %v1553_v40  ;;  %vm555_vm15 = vcmp.eq.f32.partialorder %v1561_v18, 0.0  ;;  %v630_v62 = vadd.f32 %v629_v23, %v628_v51  ;;  %v619_v3 = vsub.f32 %v475_v61, %v616_v24 }
 0x157   :  { %v552_v20 = vsel %vm550_vm8, %v551_v58, %v549_v1  ;;  %v562_v6 = vsel %vm550_vm8, 2.3561945, %v1551_v5  ;;  %v568_v25 = vand.u32 2147483648, %v1561_v18  ;;  %v620_v11 = vand.u32 2147483647, %v617_v19 }
 0x158   :  { %v428_v52 = vor.u32 %v427_v2, %v426_v30  ;;  %v556_v16 = vsel %vm555_vm15, %v554_v26, %v552_v20  ;;  %v645_v31 = vsel %vm644_vm14, %v630_v62, 0.0  ;;  %v622_v35 = vand.u32 2147483647, %v619_v3 }
 0x159   :  { %v560_v60 = vsel %vm1192_vm6, nan, %v556_v16  ;;  %646 = vadd.xlane.f32.xlu0 %v645_v31  ;;  %v642_v48 = vand.u32 127, %v1564_v39 }
 0x15a   :  { %v566_v27 = vsel %vm1204_vm3, %v562_v6, %v560_v60 }
 0x15b   :  { %v567_v7 = vand.u32 2147483647, %v566_v27  ;;  %vm655_vm4 = vcmp.eq.s32.totalorder %v642_v48, 1  ;;  %vm643_vm3 = vcmp.eq.s32.totalorder %v642_v48, 0 }
 0x15d   :  { %v569_v43 = vor.u32 %v568_v25, %v567_v7 }
 0x15f   :  { %v618_v54 = vsub.f32 %v428_v52, %v569_v43 }
 0x161   :  { %v621_v9 = vand.u32 2147483647, %v618_v54 }
 0x163   :  { %v632_v21 = vadd.f32 %v621_v9, %v620_v11 }
 0x165   :  { %v633_v53 = vadd.f32 %v632_v21, %v622_v35 }
 0x167   :  { %v634_v44 = vrot.slane %v633_v53, 4 }
 0x169   :  { %v635_v8 = vadd.f32 %v634_v44, %v633_v53 }
 0x16b   :  { %v636_v17 = vrot.slane %v635_v8, 2 }
 0x16d   :  { %v637_v4 = vadd.f32 %v636_v17, %v635_v8 }
 0x16f   :  { %v638_v34 = vrot.slane %v637_v4, 1 }
 0x171   :  { %v639_v38 = vadd.f32 %v638_v34, %v637_v4 }
 0x173   :  { %v656_v32 = vsel %vm644_vm14, %v639_v38, 0.0 }
 0x174   :  { %657 = vadd.xlane.f32.xlu0 %v656_v32 }
 0x1e6   :  { %v647_v13 = vpop.xlane.xlu0 %646 }
 0x1e7   :  { %v648_v59 = vrot.slane %v647_v13, 4 }
 0x1e9   :  { %v649_v12 = vadd.f32 %v648_v59, %v647_v13 }
 0x1eb   :  { %v650_v15 = vrot.slane %v649_v12, 2 }
 0x1ed   :  { %v651_v41 = vadd.f32 %v650_v15, %v649_v12 }
 0x1ef   :  { %v652_v5 = vrot.slane %v651_v41, 1 }
 0x1f1   :  { %v653_v56 = vadd.f32 %v652_v5, %v651_v41 }
 0x1f3   :  { %775 = vpush %v653_v56 }
 0x201   :  { %v658_v19 = vpop.xlane.xlu0 %657 }
 0x202   :  { %v659_v28 = vrot.slane %v658_v19, 4 }
 0x204   :  { %v660_v49 = vadd.f32 %v659_v28, %v658_v19 }
 0x206   :  { %v661_v40 = vrot.slane %v660_v49, 2 }
 0x208   :  { %v662_v50 = vadd.f32 %v661_v40, %v660_v49 }
 0x20a   :  { %v663_v61 = vrot.slane %v662_v50, 1 }
 0x20c   :  { %v664_v37 = vadd.f32 %v663_v61, %v662_v50 }
 0x20e   :  { %777 = vpush %v664_v37 }
 0x224   :  { %s776_s4 = spop %775 }
 0x225   :  { %v668_v47 = vstv %s776_s4 }
 0x23f   :  { %s778_s26 = spop %777 }
 0x240   :  { %v666_v46 = vstv %s778_s26 }
 0x241   :  { %v667_v42 = vsel %vm655_vm4, %v666_v46, 0.0 }
 0x242   :  { %v669_v14 = vsel %vm643_vm3, %v668_v47, %v667_v42 }
 0x243   :  { %670 = vst [vmem:[%s1460_s5] sm:$0x1] %v669_v14 }
 0x244 PF:  {}

</bundles_post_ra>
